<compile_context>
chip_gen: v7x
topology: tpu7x:2x2x1
jax: 0.10.0
libtpu: 0.0.40
codegen_flags: <defaults>
</compile_context>

<pallas_src>
import numpy as np
import jax
import jax.numpy as jnp
from jax.experimental import pallas as pl
from jax.experimental.pallas import tpu as pltpu


def _rup8(n):
    return ((n + 7) // 8) * 8


def _leaky_relu(x, slope=0.01):
    return jnp.where(x > 0, x, slope * x)


def _softplus(x):
    # torch.nn.functional.softplus with threshold=20
    return jnp.where(x > 20.0, x, jnp.log1p(jnp.exp(jnp.minimum(x, 20.0))))


def _pick_batch_tile(B, requested=None):
    """Batch tile: whole batch for tiny B, else a multiple of 8 dividing B."""
    if requested is not None:
        assert B % requested == 0 and (requested == B or requested % 8 == 0)
        return requested
    if B % 8 != 0 or B <= 8:
        return B                      # single-step path for tiny batches
    bt = min(B, 256) // 8 * 8
    while B % bt:
        bt -= 8
    return bt


def build_modelq0_forward(params, B, T, obs_dim, input_dim,
                          batch_tile=None, mxu_dtype=jnp.float32):
    """One-time setup: pack weights, build the pallas_call, return jitted fwd."""
    Cin = obs_dim + input_dim
    CH = 8                                  # conv channels
    S = params["out_mu_w"].shape[0]
    h0 = params["lin0_w"].shape[0]
    h1 = params["lin1_w"].shape[0]

    L1 = T - 1            # conv1 output length (kernel_size=2, valid)
    P1 = L1 // 2          # after pool1
    L2 = P1 - 1           # conv2 output length
    P2 = L2 // 2          # after pool2
    assert P2 >= 1, "sequence too short for the conv/pool stack"

    Tp = _rup8(T)         # per-sample row block (time axis zero-padded to x8)
    Bt = _pick_batch_tile(B, batch_tile)
    NR = Bt * Tp          # rows per grid step
    NRP = NR + 8          # scratch rows (zero tail so shifted reads stay valid)
    CW = max(Cin, CH)     # scratch width

    def _np(a):
        return np.asarray(a, dtype=np.float32)

    # ---- weight pack: one array -> one resident DMA -----------------------
    w1 = _np(params["conv1_w"])                                # (8, Cin, 2)
    w2 = _np(params["conv2_w"])                                # (8, 8, 2)
    w1s = np.concatenate([w1[:, :, 0].T, w1[:, :, 1].T], 0)    # (2*Cin, 8)
    w2s = np.concatenate([w2[:, :, 0].T, w2[:, :, 1].T], 0)    # (16, 8)
    l0 = _np(params["lin0_w"]).T                               # (8, h0)
    l1 = _np(params["lin1_w"]).T                               # (h0, h1)
    whd = np.concatenate([_np(params["out_mu_w"]).T,
                          _np(params["out_sigma_w"]).T], 1)    # (h1, 2*S)
    bhd = np.concatenate([_np(params["out_mu_b"]), _np(params["out_sigma_b"])])

    blocks = [w1s, w2s, l0, l1, whd,
              _np(params["conv1_b"])[None, :], _np(params["conv2_b"])[None, :],
              _np(params["lin0_b"])[None, :], _np(params["lin1_b"])[None, :],
              bhd[None, :]]
    width = max(b.shape[1] for b in blocks)
    offs, rows = [], 0
    for b in blocks:                       # every block starts on an 8-aligned row
        offs.append(rows)
        rows += _rup8(b.shape[0])
    wpack_np = np.zeros((rows, width), np.float32)
    for o, b in zip(offs, blocks):
        wpack_np[o:o + b.shape[0], :b.shape[1]] = b
    (O_W1S, O_W2S, O_L0, O_L1, O_WHD,
     O_B1, O_B2, O_BL0, O_BL1, O_BH) = offs
    wpack = jnp.asarray(wpack_np)

    # ---- kernel: one batch tile per grid step ------------------------------
    def kernel(x_ref, w_ref, o_ref, buf):
        f32 = jnp.float32

        def mm(a, w):                       # MXU matmul, f32 accumulation
            return jnp.dot(a.astype(mxu_dtype), w.astype(mxu_dtype),
                           preferred_element_type=f32)

        # Scratch realizes row-shifted ("next time-step") reads of each stage;
        # the zeroed tail keeps shifted reads in-bounds/finite.  Shifted rows
        # that cross sample boundaries only feed positions the final validity
        # mask discards.
        buf[...] = jnp.zeros((NRP, CW), f32)

        # conv1: taps fused -> one (NR, 2*Cin) @ (2*Cin, 8) matmul
        x = x_ref[...].astype(f32)                     # (NR, Cin)
        buf[0:NR, 0:Cin] = x
        x_next = buf[1:NR + 1, 0:Cin]                  # rows shifted up by 1
        h = mm(jnp.concatenate([x, x_next], axis=-1),
               w_ref[O_W1S:O_W1S + 2 * Cin, 0:CH])
        h = _leaky_relu(h + w_ref[O_B1:O_B1 + 1, 0:CH])          # (NR, CH)

        # pool1 (VPU max): pooled value p lives at dilated row 2p
        buf[0:NR, 0:CH] = h
        h = jnp.maximum(h, buf[1:NR + 1, 0:CH])

        # conv2: taps fused (second tap = rows shifted by 2 -> dilation 2)
        buf[0:NR, 0:CH] = h
        h = mm(jnp.concatenate([h, buf[2:NR + 2, 0:CH]], axis=-1),
               w_ref[O_W2S:O_W2S + 2 * CH, 0:CH])
        h = _leaky_relu(h + w_ref[O_B2:O_B2 + 1, 0:CH])

        # pool2 (VPU max): pooled value q lives at dilated row 4q
        buf[0:NR, 0:CH] = h
        h = jnp.maximum(h, buf[2:NR + 2, 0:CH])

        # torch.sum over length: mask the P2 valid dilated rows of each
        # per-sample Tp-row block, then sublane-reduce (no MXU hop).
        h3 = h.reshape(Bt, Tp, CH)
        t = jax.lax.broadcasted_iota(jnp.int32, (Bt, Tp, CH), 1)
        valid = jnp.logical_and((t & 3) == 0, t < 4 * P2)
        z = jnp.sum(jnp.where(valid, h3, 0.0), axis=1)           # (Bt, CH)

        # MLP head
        z = _leaky_relu(mm(z, w_ref[O_L0:O_L0 + CH, 0:h0])
                        + w_ref[O_BL0:O_BL0 + 1, 0:h0])
        z = _leaky_relu(mm(z, w_ref[O_L1:O_L1 + h0, 0:h1])
                        + w_ref[O_BL1:O_BL1 + 1, 0:h1])
        y = (mm(z, w_ref[O_WHD:O_WHD + h1, 0:2 * S])
             + w_ref[O_BH:O_BH + 1, 0:2 * S])

        lane = jax.lax.broadcasted_iota(jnp.int32, (Bt, 2 * S), 1)
        mu = jnp.clip(y, -1.0, 1.0)
        sg = jnp.clip(_softplus(y), 1e-10, 1.0)
        o_ref[...] = jnp.where(lane < S, mu, sg)
        # TODO(synk): torch.distributions.Normal has no Pallas equivalent; the
        # kernel returns its parameters (mu, sigma).

    fused = pl.pallas_call(
        kernel,
        out_shape=jax.ShapeDtypeStruct((B, 2 * S), jnp.float32),
        grid=(B // Bt,),
        in_specs=[
            pl.BlockSpec((Bt * Tp, Cin), lambda i: (i, 0)),      # batch tile
            pl.BlockSpec(wpack_np.shape, lambda i: (0, 0)),      # resident weights
        ],
        out_specs=pl.BlockSpec((Bt, 2 * S), lambda i: (i, 0)),
        scratch_shapes=[pltpu.VMEM((NRP, CW), jnp.float32)],
        compiler_params=pltpu.CompilerParams(
            dimension_semantics=("parallel",)),
    )

    @jax.jit
    def forward(obs, input_, obs_mask):
        del obs_mask  # obs_mask_enabled=False
        # TODO(synk): obs_mask_enabled=True / discrete_state=True paths not
        # implemented (module defaults are False).
        x = obs if input_dim == 0 else jnp.concatenate([obs, input_], axis=-1)
        x = x.astype(jnp.float32)                      # (B, T, Cin)
        if Tp > T:                                     # pad time axis to x8
            x = jnp.pad(x, ((0, 0), (0, Tp - T), (0, 0)))
        x2d = x.reshape(B * Tp, Cin)                   # no tap duplication
        y = fused(x2d, wpack)
        return y[:, :S], y[:, S:]

    return forward


# ---------------------------------------------------------------------------
# Synthetic init mirroring the module's layer shapes + pure-JAX reference.
# ---------------------------------------------------------------------------
def init_params(key, obs_dim, input_dim, state_dim, h_dim=(16, 16)):
    in_dim = obs_dim + input_dim
    ks = jax.random.split(key, 6)

    def conv_init(k, out_c, in_c, ksz):
        kw, kb = jax.random.split(k)
        fan_in = in_c * ksz
        bound = 1.0 / jnp.sqrt(float(fan_in))
        w = jax.random.normal(kw, (out_c, in_c, ksz), jnp.float32) / jnp.sqrt(float(fan_in))
        b = jax.random.uniform(kb, (out_c,), jnp.float32, minval=-bound, maxval=bound)
        return w, b

    def linear_kaiming(k, out_d, in_d):
        kw, kb = jax.random.split(k)
        gain = jnp.sqrt(2.0 / (1.0 + 0.01 ** 2))        # kaiming_normal_, leaky_relu
        w = gain / jnp.sqrt(float(in_d)) * jax.random.normal(kw, (out_d, in_d), jnp.float32)
        bound = 1.0 / jnp.sqrt(float(in_d))
        b = jax.random.uniform(kb, (out_d,), jnp.float32, minval=-bound, maxval=bound)
        return w, b

    def linear_small(k, out_d, in_d):
        kw, kb = jax.random.split(k)
        w = 0.01 * jax.random.normal(kw, (out_d, in_d), jnp.float32)   # normal_(0, 0.01)
        bound = 1.0 / jnp.sqrt(float(in_d))
        b = jax.random.uniform(kb, (out_d,), jnp.float32, minval=-bound, maxval=bound)
        return w, b

    p = {}
    p["conv1_w"], p["conv1_b"] = conv_init(ks[0], 8, in_dim, 2)
    p["conv2_w"], p["conv2_b"] = conv_init(ks[1], 8, 8, 2)
    p["lin0_w"], p["lin0_b"] = linear_kaiming(ks[2], h_dim[0], 8)
    p["lin1_w"], p["lin1_b"] = linear_kaiming(ks[3], h_dim[1], h_dim[0])
    p["out_mu_w"], p["out_mu_b"] = linear_small(ks[4], state_dim, h_dim[1])
    p["out_sigma_w"], p["out_sigma_b"] = linear_small(ks[5], state_dim, h_dim[1])
    return p


def modelq0_reference(obs, input_, obs_mask, params):
    """Pure-JAX reference reproducing the PyTorch forward semantics."""
    del obs_mask
    x = jnp.concatenate([obs, input_], axis=-1).astype(jnp.float32)   # (B, T, C)

    def conv1d_k2(h, w, b):            # h (B, L, Cin), w (Cout, Cin, 2)
        y = (jnp.einsum("blc,oc->blo", h[:, :-1, :], w[:, :, 0])
             + jnp.einsum("blc,oc->blo", h[:, 1:, :], w[:, :, 1]))
        return y + b[None, None, :]

    def lrelu(v):
        return jnp.where(v > 0, v, 0.01 * v)

    def pool(h):                       # MaxPool1d(2) over length axis
        nb, L, C = h.shape
        Lp = L // 2
        return jnp.max(h[:, :2 * Lp, :].reshape(nb, Lp, 2, C), axis=2)

    h = pool(lrelu(conv1d_k2(x, params["conv1_w"], params["conv1_b"])))
    h = pool(lrelu(conv1d_k2(h, params["conv2_w"], params["conv2_b"])))
    h = jnp.sum(h, axis=1)
    h = lrelu(h @ params["lin0_w"].T + params["lin0_b"])
    h = lrelu(h @ params["lin1_w"].T + params["lin1_b"])
    m = jnp.clip(h @ params["out_mu_w"].T + params["out_mu_b"], -1.0, 1.0)
    s = jnp.clip(jax.nn.softplus(h @ params["out_sigma_w"].T + params["out_sigma_b"]),
                 1e-10, 1.0)
    return m, s


if __name__ == "__main__":
    key = jax.random.PRNGKey(0)
    B, T = 16, 16
    obs_dim, input_dim, state_dim = 6, 2, 4

    k_obs, k_in, k_p = jax.random.split(key, 3)
    obs = jax.random.normal(k_obs, (B, T, obs_dim), jnp.float32)
    inp = jax.random.normal(k_in, (B, T, input_dim), jnp.float32)
    obs_mask = jnp.ones((B, T, obs_dim), jnp.float32)   # unused: obs_mask_enabled=False

    params = init_params(k_p, obs_dim, input_dim, state_dim)

    # batch_tile=8 -> grid=(2,) "parallel": exercises the batch-tiled path
    # (both v7x TensorCores); per-tile VMEM is O(Bt), independent of B.
    # For v6e/v7x MXU throughput pass mxu_dtype=jnp.bfloat16 (re-check tol).
    forward = build_modelq0_forward(params, B, T, obs_dim, input_dim,
                                    batch_tile=8)

    mu, sigma = forward(obs, inp, obs_mask)
    jax.block_until_ready((mu, sigma))

    mu_exp, sigma_exp = modelq0_reference(obs, inp, obs_mask, params)
    assert mu.shape == (B, state_dim) and sigma.shape == (B, state_dim)
    assert jnp.allclose(mu, mu_exp, atol=1e-4), (mu, mu_exp)
    assert jnp.allclose(sigma, sigma_exp, atol=1e-4), (sigma, sigma_exp)

    print("KERNEL_OK")
</pallas_src>

<mosaic_0001>
module attributes {stable_mosaic.version = 11 : i64} {
  func.func @kernel(%arg0: i32, %arg1: memref<128x8xf32, #tpu.memory_space<vmem>>, %arg2: memref<112x16xf32, #tpu.memory_space<vmem>>, %arg3: memref<8x8xf32, #tpu.memory_space<vmem>>, %arg4: memref<136x8xf32, #tpu.memory_space<vmem>>) attributes {dimension_semantics = [#tpu.dimension_semantics<parallel>], iteration_bounds = array<i64: 2>, scalar_prefetch = 0 : i64, scratch_operands = 1 : i64, tpu.core_type = #tpu.core_type<tc>, window_params = [{transform_indices = @transform_0, window_bounds = array<i64: 128, 8>}, {pipeline_mode = #tpu.pipeline_mode<synchronous>, transform_indices = @transform_1, window_bounds = array<i64: 112, 16>}, {transform_indices = @transform_2, window_bounds = array<i64: 8, 8>}]} {
    %cst = arith.constant 0.000000e+00 : f32
    %0 = vector.broadcast %cst : f32 to vector<136x8xf32>
    %c0 = arith.constant 0 : index
    %c0_0 = arith.constant 0 : index
    %1 = vector.load %arg4[%c0, %c0_0] : memref<136x8xf32, #tpu.memory_space<vmem>>, vector<136x8xf32>
    tpu.vector_store %arg4[%c0, %c0_0], %0 {strides = array<i32>} : memref<136x8xf32, #tpu.memory_space<vmem>>, vector<136x8xf32>,
    %c0_1 = arith.constant 0 : index
    %c0_2 = arith.constant 0 : index
    %2 = vector.load %arg1[%c0_1, %c0_2] : memref<128x8xf32, #tpu.memory_space<vmem>>, vector<128x8xf32>
    %c0_3 = arith.constant 0 : index
    %c0_4 = arith.constant 0 : index
    %3 = vector.load %arg4[%c0_3, %c0_4] : memref<136x8xf32, #tpu.memory_space<vmem>>, vector<128x8xf32>
    tpu.vector_store %arg4[%c0_3, %c0_4], %2 {strides = array<i32>} : memref<136x8xf32, #tpu.memory_space<vmem>>, vector<128x8xf32>,
    %c1 = arith.constant 1 : index
    %c0_5 = arith.constant 0 : index
    %4 = vector.load %arg4[%c1, %c0_5] : memref<136x8xf32, #tpu.memory_space<vmem>>, vector<128x8xf32>
    %5 = tpu.concatenate %2, %4 in 1 : vector<128x8xf32>, vector<128x8xf32> -> vector<128x16xf32>
    %c0_6 = arith.constant 0 : index
    %c0_7 = arith.constant 0 : index
    %6 = vector.load %arg2[%c0_6, %c0_7] : memref<112x16xf32, #tpu.memory_space<vmem>>, vector<16x8xf32>
    %cst_8 = arith.constant dense<0.000000e+00> : vector<128x8xf32>
    %7 = tpu.matmul %5, %6, %cst_8 {dimension_numbers = #tpu.dot_dimension_numbers<[1], [0], [0], [1], [0, 0, 1, 1], [], []>} : vector<128x16xf32>, vector<16x8xf32>, vector<128x8xf32> -> vector<128x8xf32>
    %c72 = arith.constant 72 : index
    %c0_9 = arith.constant 0 : index
    %8 = vector.load %arg2[%c72, %c0_9] : memref<112x16xf32, #tpu.memory_space<vmem>>, vector<1x8xf32>
    %9 = vector.broadcast %8 : vector<1x8xf32> to vector<128x8xf32>
    %10 = arith.addf %7, %9 : vector<128x8xf32>
    %cst_10 = arith.constant 0.000000e+00 : f32
    %11 = vector.broadcast %cst_10 : f32 to vector<128x8xf32>
    %12 = arith.cmpf ogt, %10, %11 : vector<128x8xf32>
    %cst_11 = arith.constant 0.00999999977 : f32
    %13 = vector.broadcast %cst_11 : f32 to vector<128x8xf32>
    %14 = arith.mulf %13, %10 : vector<128x8xf32>
    %15 = arith.select %12, %10, %14 : vector<128x8xi1>, vector<128x8xf32>
    %c0_12 = arith.constant 0 : index
    %c0_13 = arith.constant 0 : index
    %16 = vector.load %arg4[%c0_12, %c0_13] : memref<136x8xf32, #tpu.memory_space<vmem>>, vector<128x8xf32>
    tpu.vector_store %arg4[%c0_12, %c0_13], %15 {strides = array<i32>} : memref<136x8xf32, #tpu.memory_space<vmem>>, vector<128x8xf32>,
    %c1_14 = arith.constant 1 : index
    %c0_15 = arith.constant 0 : index
    %17 = vector.load %arg4[%c1_14, %c0_15] : memref<136x8xf32, #tpu.memory_space<vmem>>, vector<128x8xf32>
    %18 = arith.maximumf %15, %17 : vector<128x8xf32>
    %c0_16 = arith.constant 0 : index
    %c0_17 = arith.constant 0 : index
    %19 = vector.load %arg4[%c0_16, %c0_17] : memref<136x8xf32, #tpu.memory_space<vmem>>, vector<128x8xf32>
    tpu.vector_store %arg4[%c0_16, %c0_17], %18 {strides = array<i32>} : memref<136x8xf32, #tpu.memory_space<vmem>>, vector<128x8xf32>,
    %c2 = arith.constant 2 : index
    %c0_18 = arith.constant 0 : index
    %20 = vector.load %arg4[%c2, %c0_18] : memref<136x8xf32, #tpu.memory_space<vmem>>, vector<128x8xf32>
    %21 = tpu.concatenate %18, %20 in 1 : vector<128x8xf32>, vector<128x8xf32> -> vector<128x16xf32>
    %c16 = arith.constant 16 : index
    %c0_19 = arith.constant 0 : index
    %22 = vector.load %arg2[%c16, %c0_19] : memref<112x16xf32, #tpu.memory_space<vmem>>, vector<16x8xf32>
    %cst_20 = arith.constant dense<0.000000e+00> : vector<128x8xf32>
    %23 = tpu.matmul %21, %22, %cst_20 {dimension_numbers = #tpu.dot_dimension_numbers<[1], [0], [0], [1], [0, 0, 1, 1], [], []>} : vector<128x16xf32>, vector<16x8xf32>, vector<128x8xf32> -> vector<128x8xf32>
    %c80 = arith.constant 80 : index
    %c0_21 = arith.constant 0 : index
    %24 = vector.load %arg2[%c80, %c0_21] : memref<112x16xf32, #tpu.memory_space<vmem>>, vector<1x8xf32>
    %25 = vector.broadcast %24 : vector<1x8xf32> to vector<128x8xf32>
    %26 = arith.addf %23, %25 : vector<128x8xf32>
    %cst_22 = arith.constant 0.000000e+00 : f32
    %27 = vector.broadcast %cst_22 : f32 to vector<128x8xf32>
    %28 = arith.cmpf ogt, %26, %27 : vector<128x8xf32>
    %cst_23 = arith.constant 0.00999999977 : f32
    %29 = vector.broadcast %cst_23 : f32 to vector<128x8xf32>
    %30 = arith.mulf %29, %26 : vector<128x8xf32>
    %31 = arith.select %28, %26, %30 : vector<128x8xi1>, vector<128x8xf32>
    %c0_24 = arith.constant 0 : index
    %c0_25 = arith.constant 0 : index
    %32 = vector.load %arg4[%c0_24, %c0_25] : memref<136x8xf32, #tpu.memory_space<vmem>>, vector<128x8xf32>
    tpu.vector_store %arg4[%c0_24, %c0_25], %31 {strides = array<i32>} : memref<136x8xf32, #tpu.memory_space<vmem>>, vector<128x8xf32>,
    %c2_26 = arith.constant 2 : index
    %c0_27 = arith.constant 0 : index
    %33 = vector.load %arg4[%c2_26, %c0_27] : memref<136x8xf32, #tpu.memory_space<vmem>>, vector<128x8xf32>
    %34 = arith.maximumf %31, %33 : vector<128x8xf32>
    %35 = vector.shape_cast %34 : vector<128x8xf32> to vector<8x16x8xf32>
    %36 = tpu.iota {dimensions = array<i32: 1>} : vector<8x16x8xi32>
    %c3_i32 = arith.constant 3 : i32
    %37 = vector.broadcast %c3_i32 : i32 to vector<8x16x8xi32>
    %38 = arith.andi %36, %37 : vector<8x16x8xi32>
    %c0_i32 = arith.constant 0 : i32
    %39 = vector.broadcast %c0_i32 : i32 to vector<8x16x8xi32>
    %40 = arith.cmpi eq, %38, %39 : vector<8x16x8xi32>
    %c12_i32 = arith.constant 12 : i32
    %41 = vector.broadcast %c12_i32 : i32 to vector<8x16x8xi32>
    %42 = arith.cmpi slt, %36, %41 : vector<8x16x8xi32>
    %43 = arith.andi %40, %42 : vector<8x16x8xi1>
    %cst_28 = arith.constant 0.000000e+00 : f32
    %44 = vector.broadcast %cst_28 : f32 to vector<8x16x8xf32>
    %45 = arith.select %43, %35, %44 : vector<8x16x8xi1>, vector<8x16x8xf32>
    %cst_29 = arith.constant dense<0.000000e+00> : vector<8x8xf32>
    %46 = vector.multi_reduction <add>, %45, %cst_29 [1] : vector<8x16x8xf32> to vector<8x8xf32>
    %c32 = arith.constant 32 : index
    %c0_30 = arith.constant 0 : index
    %47 = vector.load %arg2[%c32, %c0_30] : memref<112x16xf32, #tpu.memory_space<vmem>>, vector<8x16xf32>
    %cst_31 = arith.constant dense<0.000000e+00> : vector<8x16xf32>
    %48 = tpu.matmul %46, %47, %cst_31 {dimension_numbers = #tpu.dot_dimension_numbers<[1], [0], [0], [1], [0, 0, 1, 1], [], []>} : vector<8x8xf32>, vector<8x16xf32>, vector<8x16xf32> -> vector<8x16xf32>
    %c88 = arith.constant 88 : index
    %c0_32 = arith.constant 0 : index
    %49 = vector.load %arg2[%c88, %c0_32] : memref<112x16xf32, #tpu.memory_space<vmem>>, vector<1x16xf32>
    %50 = vector.broadcast %49 : vector<1x16xf32> to vector<8x16xf32>
    %51 = arith.addf %48, %50 : vector<8x16xf32>
    %cst_33 = arith.constant 0.000000e+00 : f32
    %52 = vector.broadcast %cst_33 : f32 to vector<8x16xf32>
    %53 = arith.cmpf ogt, %51, %52 : vector<8x16xf32>
    %cst_34 = arith.constant 0.00999999977 : f32
    %54 = vector.broadcast %cst_34 : f32 to vector<8x16xf32>
    %55 = arith.mulf %54, %51 : vector<8x16xf32>
    %56 = arith.select %53, %51, %55 : vector<8x16xi1>, vector<8x16xf32>
    %c40 = arith.constant 40 : index
    %c0_35 = arith.constant 0 : index
    %57 = vector.load %arg2[%c40, %c0_35] : memref<112x16xf32, #tpu.memory_space<vmem>>, vector<16x16xf32>
    %cst_36 = arith.constant dense<0.000000e+00> : vector<8x16xf32>
    %58 = tpu.matmul %56, %57, %cst_36 {dimension_numbers = #tpu.dot_dimension_numbers<[1], [0], [0], [1], [0, 0, 1, 1], [], []>} : vector<8x16xf32>, vector<16x16xf32>, vector<8x16xf32> -> vector<8x16xf32>
    %c96 = arith.constant 96 : index
    %c0_37 = arith.constant 0 : index
    %59 = vector.load %arg2[%c96, %c0_37] : memref<112x16xf32, #tpu.memory_space<vmem>>, vector<1x16xf32>
    %60 = vector.broadcast %59 : vector<1x16xf32> to vector<8x16xf32>
    %61 = arith.addf %58, %60 : vector<8x16xf32>
    %cst_38 = arith.constant 0.000000e+00 : f32
    %62 = vector.broadcast %cst_38 : f32 to vector<8x16xf32>
    %63 = arith.cmpf ogt, %61, %62 : vector<8x16xf32>
    %cst_39 = arith.constant 0.00999999977 : f32
    %64 = vector.broadcast %cst_39 : f32 to vector<8x16xf32>
    %65 = arith.mulf %64, %61 : vector<8x16xf32>
    %66 = arith.select %63, %61, %65 : vector<8x16xi1>, vector<8x16xf32>
    %c56 = arith.constant 56 : index
    %c0_40 = arith.constant 0 : index
    %67 = vector.load %arg2[%c56, %c0_40] : memref<112x16xf32, #tpu.memory_space<vmem>>, vector<16x8xf32>
    %cst_41 = arith.constant dense<0.000000e+00> : vector<8x8xf32>
    %68 = tpu.matmul %66, %67, %cst_41 {dimension_numbers = #tpu.dot_dimension_numbers<[1], [0], [0], [1], [0, 0, 1, 1], [], []>} : vector<8x16xf32>, vector<16x8xf32>, vector<8x8xf32> -> vector<8x8xf32>
    %c104 = arith.constant 104 : index
    %c0_42 = arith.constant 0 : index
    %69 = vector.load %arg2[%c104, %c0_42] : memref<112x16xf32, #tpu.memory_space<vmem>>, vector<1x8xf32>
    %70 = vector.broadcast %69 : vector<1x8xf32> to vector<8x8xf32>
    %71 = arith.addf %68, %70 : vector<8x8xf32>
    %72 = tpu.iota {dimensions = array<i32: 1>} : vector<8x8xi32>
    %cst_43 = arith.constant -1.000000e+00 : f32
    %cst_44 = arith.constant 1.000000e+00 : f32
    %73 = vector.broadcast %cst_43 : f32 to vector<8x8xf32>
    %74 = arith.maximumf %73, %71 : vector<8x8xf32>
    %75 = vector.broadcast %cst_44 : f32 to vector<8x8xf32>
    %76 = arith.minimumf %75, %74 : vector<8x8xf32>
    %cst_45 = arith.constant 2.000000e+01 : f32
    %77 = vector.broadcast %cst_45 : f32 to vector<8x8xf32>
    %78 = arith.cmpf ogt, %71, %77 : vector<8x8xf32>
    %cst_46 = arith.constant 2.000000e+01 : f32
    %79 = vector.broadcast %cst_46 : f32 to vector<8x8xf32>
    %80 = arith.minimumf %71, %79 : vector<8x8xf32>
    %81 = math.exp %80 : vector<8x8xf32>
    %82 = math.log1p %81 : vector<8x8xf32>
    %83 = arith.select %78, %71, %82 : vector<8x8xi1>, vector<8x8xf32>
    %cst_47 = arith.constant 1.000000e-10 : f32
    %cst_48 = arith.constant 1.000000e+00 : f32
    %84 = vector.broadcast %cst_47 : f32 to vector<8x8xf32>
    %85 = arith.maximumf %84, %83 : vector<8x8xf32>
    %86 = vector.broadcast %cst_48 : f32 to vector<8x8xf32>
    %87 = arith.minimumf %86, %85 : vector<8x8xf32>
    %c4_i32 = arith.constant 4 : i32
    %88 = vector.broadcast %c4_i32 : i32 to vector<8x8xi32>
    %89 = arith.cmpi slt, %72, %88 : vector<8x8xi32>
    %90 = arith.select %89, %76, %87 : vector<8x8xi1>, vector<8x8xf32>
    %c0_49 = arith.constant 0 : index
    %c0_50 = arith.constant 0 : index
    %91 = vector.load %arg3[%c0_49, %c0_50] : memref<8x8xf32, #tpu.memory_space<vmem>>, vector<8x8xf32>
    tpu.vector_store %arg3[%c0_49, %c0_50], %90 {strides = array<i32>} : memref<8x8xf32, #tpu.memory_space<vmem>>, vector<8x8xf32>,
    return
  }
  func.func @transform_0(%arg0: i32) -> (i32, i32) {
    %c0_i32 = arith.constant 0 : i32
    %c0_i32_0 = arith.constant 0 : i32
    return %arg0, %c0_i32 : i32, i32
  }
  func.func @transform_1(%arg0: i32) -> (i32, i32) {
    %c0_i32 = arith.constant 0 : i32
    %c0_i32_0 = arith.constant 0 : i32
    %c0_i32_1 = arith.constant 0 : i32
    return %c0_i32, %c0_i32_0 : i32, i32
  }
  func.func @transform_2(%arg0: i32) -> (i32, i32) {
    %c0_i32 = arith.constant 0 : i32
    %c0_i32_0 = arith.constant 0 : i32
    return %arg0, %c0_i32 : i32, i32
  }
}

</mosaic_0001>

<bundles_post_ra>
// kernel: forward.1
= control target key start
LH: loop header
LB: loop body
LE: loop exit
PB: predicated region body
PF: predicated region fallthrough
CT: control target
= control target key end

     0   :  { %s1663_s9 = smov 0   ;;  %s2217_s0 = inlined_call_operand.vmem [shape: f32[256,8], index: 0, kind: input, shape index: {}]   ;;  %s2218_s1 = inlined_call_operand.vmem [shape: f32[112,16], index: 1, kind: input, shape index: {}]   ;;  %s2219_s2 = inlined_call_operand.vmem [shape: f32[16,8], index: 2, kind: output, shape index: {}]  }
   0x1 LB: > { %s1669_s10 = sadd.s32 4294967295, %s1642_s9   ;;  %p1440_p0 = scmp.ge.s32.totalorder %s1642_s9, 1  ;;  %s1642_s9 = sphi %s1663_s9, %s12_s9  }
   0x2   : > { %p113_p1 = scmp.lt.s32.totalorder %s1642_s9, 3 }
   0x4   : > { %p114_p2 = pnand %p1440_p0, %p113_p1 }
   0x5   : > { %s1441_s11 = sshll.u32 (!%p114_p2), %s1669_s10, 4  ;;  %vm144_vm0 = vcmask (!%p114_p2), 64512   ;;  %v1644_v0 = vmov (!%p114_p2), 0.0   ;;  %v290_v1 = vld [vmem:[%s2218_s1] sm:$0xff] (!%p114_p2)  ;;  %v291_v2 = vld [vmem:[%s2218_s1 + $0x8] sm:$0xff] (!%p114_p2)  ;;  %s1645_s21 = smov (!%p114_p2), 8  }
   0x6   : > { %117 = sbr.rel (%p114_p2) target bundleno = 1463 (0x5b7), region = 28  ;;  %p1674_p3 = scmp.lt.s32.totalorder (!%p114_p2), %s1441_s11, 31  ;;  %145 = vst.msk [vmem:[#allocation2] sm:$0xff] (!%p114_p2), %vm144_vm0, %v1644_v0  ;;  %146 = vst.msk [vmem:[#allocation2 + $0x8] sm:$0xff] (!%p114_p2), %vm144_vm0, %v1644_v0  ;;  %v1606_v3 = vpack.c.bf16 (!%p114_p2), %v291_v2, %v290_v1  ;;  %vm297_vm1 = vcmask (!%p114_p2), 130048  }
   0x7   : > { %147 = vst.msk [vmem:[#allocation2 + $0x10] sm:$0xff] (!%p114_p2), %vm144_vm0, %v1644_v0  ;;  %148 = vst.msk [vmem:[#allocation2 + $0x18] sm:$0xff] (!%p114_p2), %vm144_vm0, %v1644_v0  ;;  %p140_p4 = scmp.lt.s32.totalorder (!%p114_p2), %s1669_s10, 1 }
   0x8   : > { %149 = vst.msk [vmem:[#allocation2 + $0x20] sm:$0xff] (!%p114_p2), %vm144_vm0, %v1644_v0  ;;  %150 = vst.msk [vmem:[#allocation2 + $0x28] sm:$0xff] (!%p114_p2), %vm144_vm0, %v1644_v0  ;;  %1607 = vmatprep.subr.bf16.mxu0 (!%p114_p2), %v1606_v3 }
   0x9   : > { %151 = vst.msk [vmem:[#allocation2 + $0x30] sm:$0xff] (!%p114_p2), %vm144_vm0, %v1644_v0  ;;  %152 = vst.msk [vmem:[#allocation2 + $0x38] sm:$0xff] (!%p114_p2), %vm144_vm0, %v1644_v0  ;;  %1609 = vmatpush3.bf16.msra.mxu0 (!%p114_p2), %v1606_v3 }
   0xa   : > { %153 = vst.msk [vmem:[#allocation2 + $0x40] sm:$0xff] (!%p114_p2), %vm144_vm0, %v1644_v0  ;;  %154 = vst.msk [vmem:[#allocation2 + $0x48] sm:$0xff] (!%p114_p2), %vm144_vm0, %v1644_v0  ;;  %1587 = vmatprep.subr.mxu0 (!%p114_p2), %v1644_v0 }
   0xb   : > { %155 = vst.msk [vmem:[#allocation2 + $0x50] sm:$0xff] (!%p114_p2), %vm144_vm0, %v1644_v0  ;;  %156 = vst.msk [vmem:[#allocation2 + $0x58] sm:$0xff] (!%p114_p2), %vm144_vm0, %v1644_v0 }
   0xc   : > { %157 = vst.msk [vmem:[#allocation2 + $0x60] sm:$0xff] (!%p114_p2), %vm144_vm0, %v1644_v0  ;;  %158 = vst.msk [vmem:[#allocation2 + $0x68] sm:$0xff] (!%p114_p2), %vm144_vm0, %v1644_v0 }
   0xd   : > { %159 = vst.msk [vmem:[#allocation2 + $0x70] sm:$0xff] %vm144_vm0, %v1644_v0  ;;  %160 = vst.msk [vmem:[#allocation2 + $0x78] sm:$0xff] %vm144_vm0, %v1644_v0  ;;  %s2226_s11 = smov (!%p1674_p3, %s1441_s11), 31  ;;  %s2228_s10 = smov (!%p140_p4, %s1669_s10), 1 }
   0xe   : > { %161 = vst.msk [vmem:[#allocation2 + $0x80] sm:$0xff] %vm144_vm0, %v1644_v0  ;;  %s1442_s17 = sshll.u32 %s2226_s11, 3 }
   0xf   : > { %s1723_s20 = scalar_lea.vmem %s2217_s0, %s1442_s17 }
  0x10   : > { %v1727_v4 = vld [vmem:[%s1723_s20] sm:$0xff]  ;;  %v1730_v5 = vld [vmem:[%s1723_s20 + $0x8] sm:$0xff]  ;;  %v1733_v6 = vld [vmem:[%s1723_s20 + $0x10] sm:$0xff] }
  0x11   : > { %178 = vst.msk [vmem:[#allocation2] sm:$0xff] %vm144_vm0, %v1727_v4  ;;  %179 = vst.msk [vmem:[#allocation2 + $0x8] sm:$0xff] %vm144_vm0, %v1730_v5  ;;  %v1740_v7 = vld [vmem:[%s1723_s20 + $0x18] sm:$0xff]  ;;  %v1745_v8 = vld [vmem:[%s1723_s20 + $0x20] sm:$0xff] }
  0x12   : > { %180 = vst.msk [vmem:[#allocation2 + $0x10] sm:$0xff] %vm144_vm0, %v1733_v6  ;;  %v1748_v9 = vld [vmem:[%s1723_s20 + $0x28] sm:$0xff]  ;;  %181 = vst.msk [vmem:[#allocation2 + $0x18] sm:$0xff] %vm144_vm0, %v1740_v7  ;;  %v1757_v10 = vld [vmem:[%s1723_s20 + $0x30] sm:$0xff] }
  0x13   : > { %182 = vst.msk [vmem:[#allocation2 + $0x20] sm:$0xff] %vm144_vm0, %v1745_v8  ;;  %183 = vst.msk [vmem:[#allocation2 + $0x28] sm:$0xff] %vm144_vm0, %v1748_v9  ;;  %v1760_v11 = vld [vmem:[%s1723_s20 + $0x38] sm:$0xff]  ;;  %v1763_v12 = vld [vmem:[%s1723_s20 + $0x40] sm:$0xff] }
  0x14   : > { %184 = vst.msk [vmem:[#allocation2 + $0x30] sm:$0xff] %vm144_vm0, %v1757_v10  ;;  %185 = vst.msk [vmem:[#allocation2 + $0x38] sm:$0xff] %vm144_vm0, %v1760_v11  ;;  %v1772_v13 = vld [vmem:[%s1723_s20 + $0x48] sm:$0xff]  ;;  %v1775_v14 = vld [vmem:[%s1723_s20 + $0x50] sm:$0xff] }
  0x15   : > { %186 = vst.msk [vmem:[#allocation2 + $0x40] sm:$0xff] %vm144_vm0, %v1763_v12  ;;  %v1778_v15 = vld [vmem:[%s1723_s20 + $0x58] sm:$0xff]  ;;  %187 = vst.msk [vmem:[#allocation2 + $0x48] sm:$0xff] %vm144_vm0, %v1772_v13  ;;  %v1787_v16 = vld [vmem:[%s1723_s20 + $0x60] sm:$0xff] }
  0x16   : > { %188 = vst.msk [vmem:[#allocation2 + $0x50] sm:$0xff] %vm144_vm0, %v1775_v14  ;;  %189 = vst.msk [vmem:[#allocation2 + $0x58] sm:$0xff] %vm144_vm0, %v1778_v15  ;;  %v1790_v17 = vld [vmem:[%s1723_s20 + $0x68] sm:$0xff]  ;;  %v1793_v18 = vld [vmem:[%s1723_s20 + $0x70] sm:$0xff] }
  0x17   : > { %190 = vst.msk [vmem:[#allocation2 + $0x60] sm:$0xff] %vm144_vm0, %v1787_v16  ;;  %191 = vst.msk [vmem:[#allocation2 + $0x68] sm:$0xff] %vm144_vm0, %v1790_v17  ;;  %v1802_v19 = vld [vmem:[%s1723_s20 + $0x78] sm:$0xff]  ;;  %s1443_s20 = sshll.u32 %s2228_s10, 3 }
  0x18   : > { %192 = vst.msk [vmem:[#allocation2 + $0x70] sm:$0xff] %vm144_vm0, %v1793_v18  ;;  %193 = vst.msk [vmem:[#allocation2 + $0x78] sm:$0xff] %vm144_vm0, %v1802_v19  ;;  %v194_v20 = vld [vmem:[#allocation2 + $0x1] sm:$0xff]  ;;  %s143_s23 = scalar_lea.vmem %s2219_s2, %s1443_s20 }
  0x19   : > { %226 = vrot.lane.b32.xlu0 %v194_v20, %s1645_s21  ;;  %v196_v21 = vld [vmem:[#allocation2 + $0x11] sm:$0xff]  ;;  %v195_v22 = vld [vmem:[#allocation2 + $0x9] sm:$0xff] }
  0x1a   : > { %230 = vrot.lane.b32.xlu1 %v196_v21, %s1645_s21  ;;  %v197_v23 = vld [vmem:[#allocation2 + $0x19] sm:$0xff]  ;;  %v198_v24 = vld [vmem:[#allocation2 + $0x21] sm:$0xff] }
  0x1b   : > { %v199_v25 = vld [vmem:[#allocation2 + $0x29] sm:$0xff]  ;;  %v200_v26 = vld [vmem:[#allocation2 + $0x31] sm:$0xff] }
  0x1c   : > { %v201_v27 = vld [vmem:[#allocation2 + $0x39] sm:$0xff]  ;;  %v202_v28 = vld [vmem:[#allocation2 + $0x41] sm:$0xff] }
  0x1d   : > { %228 = vrot.lane.b32.xlu0 %v195_v22, %s1645_s21  ;;  %v203_v29 = vld [vmem:[#allocation2 + $0x49] sm:$0xff]  ;;  %v204_v30 = vld [vmem:[#allocation2 + $0x51] sm:$0xff] }
  0x1e   : > { %232 = vrot.lane.b32.xlu1 %v197_v23, %s1645_s21  ;;  %v205_v31 = vld [vmem:[#allocation2 + $0x59] sm:$0xff]  ;;  %v206_v32 = vld [vmem:[#allocation2 + $0x61] sm:$0xff] }
  0x1f   : > { %v207_v33 = vld [vmem:[#allocation2 + $0x69] sm:$0xff]  ;;  %v208_v34 = vld [vmem:[#allocation2 + $0x71] sm:$0xff]  ;;  %v209_v35 = vld [vmem:[#allocation2 + $0x79] sm:$0xff] }
  0x21   : > { %234 = vrot.lane.b32.xlu0 %v198_v24, %s1645_s21 }
  0x22   : > { %236 = vrot.lane.b32.xlu1 %v199_v25, %s1645_s21 }
  0x25   : > { %238 = vrot.lane.b32.xlu0 %v200_v26, %s1645_s21 }
  0x26   : > { %240 = vrot.lane.b32.xlu1 %v201_v27, %s1645_s21 }
  0x29   : > { %242 = vrot.lane.b32.xlu0 %v202_v28, %s1645_s21 }
  0x2a   : > { %244 = vrot.lane.b32.xlu1 %v203_v29, %s1645_s21 }
  0x2d   : > { %246 = vrot.lane.b32.xlu0 %v204_v30, %s1645_s21 }
  0x2e   : > { %248 = vrot.lane.b32.xlu1 %v205_v31, %s1645_s21 }
  0x31   : > { %250 = vrot.lane.b32.xlu0 %v206_v32, %s1645_s21 }
  0x32   : > { %252 = vrot.lane.b32.xlu1 %v207_v33, %s1645_s21 }
  0x35   : > { %254 = vrot.lane.b32.xlu0 %v208_v34, %s1645_s21 }
  0x36   : > { %256 = vrot.lane.b32.xlu1 %v209_v35, %s1645_s21 }
  0x8b   : > { %v227_v36 = vpop.permute.xlu0 %226 }
  0x8c   : > { %v274_v37 = vsel %vm144_vm0, %v1727_v4, %v227_v36  ;;  %v231_v38 = vpop.permute.xlu1 %230 }
  0x8d   : > { %1535 = vmatprep.mubr.msk.f32.mxu0 %vm297_vm1, %v274_v37  ;;  %v276_v39 = vsel %vm144_vm0, %v1733_v6, %v231_v38  ;;  %v700_v6 = vld [vmem:[%s2218_s1 + $0x18] sm:$0xff] }
  0x8f   : > { %v229_v40 = vpop.permute.xlu0 %228 }
  0x90   : > { %v275_v41 = vsel %vm144_vm0, %v1730_v5, %v229_v40  ;;  %v233_v42 = vpop.permute.xlu1 %232  ;;  %v699_v5 = vld [vmem:[%s2218_s1 + $0x10] sm:$0xff] }
  0x91   : > { %1536 = vmatmul.mubr.msk.f32.vlgmr.msra.gmra.mrb[0].mxu0 %vm297_vm1, %v275_v41  ;;  %v277_v43 = vsel %vm144_vm0, %v1740_v7, %v233_v42  ;;  %v1610_v7 = vpack.c.bf16 %v700_v6, %v699_v5 }
  0x92   : > { %1538 = vmatprep.mubr.msk.f32.mxu0 %vm297_vm1, %v276_v39 }
  0x93   : > { %v235_v44 = vpop.permute.xlu0 %234  ;;  %1611 = vmatprep.subr.bf16.mxu1 %v1610_v7 }
  0x94   : > { %v278_v45 = vsel %vm144_vm0, %v1745_v8, %v235_v44  ;;  %v237_v46 = vpop.permute.xlu1 %236  ;;  %1613 = vmatpush3.bf16.msra.mxu1 %v1610_v7  ;;  %v1879_v8 = vld [vmem:[%s2218_s1 + $0x48] ss:$0 sm:$0xff] }
  0x95   : > { %1539 = vmatmul.mubr.msk.f32.gmra.mrb[2].mxu0 %vm297_vm1, %v277_v43  ;;  %v279_v47 = vsel %vm144_vm0, %v1748_v9, %v237_v46 }
  0x96   : > { %1541 = vmatprep.mubr.msk.f32.mxu0 %vm297_vm1, %v278_v45 }
  0x97   : > { %v239_v48 = vpop.permute.xlu0 %238 }
  0x98   : > { %v280_v49 = vsel %vm144_vm0, %v1757_v10, %v239_v48  ;;  %v241_v50 = vpop.permute.xlu1 %240 }
  0x99   : > { %1542 = vmatmul.mubr.msk.f32.gmra.mrb[4].mxu0 %vm297_vm1, %v279_v47  ;;  %v281_v51 = vsel %vm144_vm0, %v1760_v11, %v241_v50 }
  0x9a   : > { %1544 = vmatprep.mubr.msk.f32.mxu0 %vm297_vm1, %v280_v49 }
  0x9b   : > { %v243_v52 = vpop.permute.xlu0 %242 }
  0x9c   : > { %v282_v53 = vsel %vm144_vm0, %v1763_v12, %v243_v52  ;;  %v245_v54 = vpop.permute.xlu1 %244 }
  0x9d   : > { %1545 = vmatmul.mubr.msk.f32.gmra.mrb[6].mxu0 %vm297_vm1, %v281_v51  ;;  %v283_v55 = vsel %vm144_vm0, %v1772_v13, %v245_v54 }
  0x9e   : > { %1547 = vmatprep.mubr.msk.f32.mxu0 %vm297_vm1, %v282_v53 }
  0x9f   : > { %v247_v56 = vpop.permute.xlu0 %246 }
  0xa0   : > { %v284_v57 = vsel %vm144_vm0, %v1775_v14, %v247_v56  ;;  %v249_v58 = vpop.permute.xlu1 %248 }
  0xa1   : > { %1548 = vmatmul.mubr.msk.f32.gmra.mrb[8].mxu0 %vm297_vm1, %v283_v55  ;;  %v285_v59 = vsel %vm144_vm0, %v1778_v15, %v249_v58 }
  0xa2   : > { %1550 = vmatprep.mubr.msk.f32.mxu0 %vm297_vm1, %v284_v57 }
  0xa3   : > { %v251_v60 = vpop.permute.xlu0 %250 }
  0xa4   : > { %v286_v61 = vsel %vm144_vm0, %v1787_v16, %v251_v60  ;;  %v253_v62 = vpop.permute.xlu1 %252 }
  0xa5   : > { %1551 = vmatmul.mubr.msk.f32.gmra.mrb[10].mxu0 %vm297_vm1, %v285_v59  ;;  %v287_v63 = vsel %vm144_vm0, %v1790_v17, %v253_v62 }
  0xa6   : > { %1553 = vmatprep.mubr.msk.f32.mxu0 %vm297_vm1, %v286_v61 }
  0xa7   : > { %v255_v1 = vpop.permute.xlu0 %254 }
  0xa8   : > { %v288_v2 = vsel %vm144_vm0, %v1793_v18, %v255_v1  ;;  %v257_v3 = vpop.permute.xlu1 %256 }
  0xa9   : > { %1554 = vmatmul.mubr.msk.f32.gmra.mrb[12].mxu0 %vm297_vm1, %v287_v63  ;;  %v289_v4 = vsel %vm144_vm0, %v1802_v19, %v257_v3 }
  0xaa   : > { %1556 = vmatprep.mubr.msk.f32.mxu0 %vm297_vm1, %v288_v2 }
  0xad   : > { %1557 = vmatmul.mubr.msk.f32.gmra.mrb[14].mxu0 %vm297_vm1, %v289_v4 }
 0x164   : > { %v1537_v9 = vpop.f32.mrb[0].mxu0 }
 0x165   : > { %v418_v10 = vadd.f32 %v1537_v9, %v1879_v8  ;;  %v412_v11 = vpop.f32.mrb[1].mxu0 }
 0x166   : > { %v413_v12 = vadd.f32 %v1879_v8, %v412_v11 }
 0x167   : > { %vm492_vm2 = vcmp.gt.f32.partialorder %v418_v10, 0.0  ;;  %v508_v13 = vmul.f32 0.01, %v418_v10 }
 0x168   : > { %vm491_vm3 = vcmp.gt.f32.partialorder %v413_v12, 0.0  ;;  %v507_v14 = vmul.f32 0.01, %v413_v12  ;;  %v1540_v15 = vpop.f32.mrb[2].mxu0 }
 0x169   : > { %v524_v16 = vsel %vm492_vm2, %v418_v10, %v508_v13  ;;  %v428_v17 = vadd.f32 %v1540_v15, %v1879_v8  ;;  %v422_v18 = vpop.f32.mrb[3].mxu0 }
 0x16a   : > { %540 = vst.msk [vmem:[#allocation2 + $0x8] sm:$0xff] %vm144_vm0, %v524_v16  ;;  %v523_v19 = vsel %vm491_vm3, %v413_v12, %v507_v14  ;;  %v423_v20 = vadd.f32 %v1879_v8, %v422_v18 }
 0x16b   : > { %539 = vst.msk [vmem:[#allocation2] sm:$0xff] %vm144_vm0, %v523_v19  ;;  %vm494_vm4 = vcmp.gt.f32.partialorder %v428_v17, 0.0  ;;  %v510_v21 = vmul.f32 0.01, %v428_v17 }
 0x16c   : > { %vm493_vm5 = vcmp.gt.f32.partialorder %v423_v20, 0.0  ;;  %v509_v22 = vmul.f32 0.01, %v423_v20  ;;  %v1543_v23 = vpop.f32.mrb[4].mxu0 }
 0x16d   : > { %v526_v24 = vsel %vm494_vm4, %v428_v17, %v510_v21  ;;  %v438_v25 = vadd.f32 %v1543_v23, %v1879_v8  ;;  %v432_v26 = vpop.f32.mrb[5].mxu0  ;;  %vm1646_vm4 = vmmov 0  }
 0x16e   : > { %542 = vst.msk [vmem:[#allocation2 + $0x18] sm:$0xff] %vm144_vm0, %v526_v24  ;;  %v525_v27 = vsel %vm493_vm5, %v423_v20, %v509_v22  ;;  %v433_v28 = vadd.f32 %v1879_v8, %v432_v26  ;;  %1589 = vmatprep.mubr.msk.f32.mxu0 %vm1646_vm4, %v1644_v0 }
 0x16f   : > { %541 = vst.msk [vmem:[#allocation2 + $0x10] sm:$0xff] %vm144_vm0, %v525_v27  ;;  %vm496_vm6 = vcmp.gt.f32.partialorder %v438_v25, 0.0  ;;  %v512_v29 = vmul.f32 0.01, %v438_v25 }
 0x170   : > { %vm495_vm7 = vcmp.gt.f32.partialorder %v433_v28, 0.0  ;;  %v511_v30 = vmul.f32 0.01, %v433_v28  ;;  %v1546_v31 = vpop.f32.mrb[6].mxu0 }
 0x171   : > { %v528_v32 = vsel %vm496_vm6, %v438_v25, %v512_v29  ;;  %v448_v33 = vadd.f32 %v1546_v31, %v1879_v8  ;;  %v442_v34 = vpop.f32.mrb[7].mxu0 }
 0x172   : > { %v555_v35 = vld [vmem:[#allocation2 + $0x1] sm:$0xff]  ;;  %544 = vst.msk [vmem:[#allocation2 + $0x28] sm:$0xff] %vm144_vm0, %v528_v32  ;;  %v527_v36 = vsel %vm495_vm7, %v433_v28, %v511_v30  ;;  %v443_v37 = vadd.f32 %v1879_v8, %v442_v34 }
 0x173   : > { %v1894_v38 = vmax.f32 %v523_v19, %v555_v35  ;;  %543 = vst.msk [vmem:[#allocation2 + $0x20] sm:$0xff] %vm144_vm0, %v527_v36  ;;  %vm498_vm8 = vcmp.gt.f32.partialorder %v448_v33, 0.0  ;;  %v514_v39 = vmul.f32 0.01, %v448_v33 }
 0x174   : > { %vm497_vm9 = vcmp.gt.f32.partialorder %v443_v37, 0.0  ;;  %v513_v40 = vmul.f32 0.01, %v443_v37  ;;  %v1549_v41 = vpop.f32.mrb[8].mxu0 }
 0x175   : > { %587 = vst.msk [vmem:[#allocation2] sm:$0xff] %vm144_vm0, %v1894_v38  ;;  %v1899_v42 = vsel %vm498_vm8, %v448_v33, %v514_v39  ;;  %v458_v43 = vadd.f32 %v1549_v41, %v1879_v8  ;;  %v452_v44 = vpop.f32.mrb[9].mxu0 }
 0x176   : > { %v556_v45 = vld [vmem:[#allocation2 + $0x9] sm:$0xff]  ;;  %v557_v46 = vld [vmem:[#allocation2 + $0x11] sm:$0xff]  ;;  %546 = vst.msk [vmem:[#allocation2 + $0x38] sm:$0xff] %vm144_vm0, %v1899_v42  ;;  %v529_v47 = vsel %vm497_vm9, %v443_v37, %v513_v40  ;;  %v453_v48 = vadd.f32 %v1879_v8, %v452_v44 }
 0x177   : > { %v1905_v49 = vmax.f32 %v524_v16, %v556_v45  ;;  %v1907_v50 = vmax.f32 %v525_v27, %v557_v46  ;;  %545 = vst.msk [vmem:[#allocation2 + $0x30] sm:$0xff] %vm144_vm0, %v529_v47  ;;  %vm500_vm10 = vcmp.gt.f32.partialorder %v458_v43, 0.0  ;;  %v516_v51 = vmul.f32 0.01, %v458_v43 }
 0x178   : > { %vm499_vm11 = vcmp.gt.f32.partialorder %v453_v48, 0.0  ;;  %v515_v52 = vmul.f32 0.01, %v453_v48  ;;  %v1552_v53 = vpop.f32.mrb[10].mxu0 }
 0x179   : > { %589 = vst.msk [vmem:[#allocation2 + $0x10] sm:$0xff] %vm144_vm0, %v1907_v50  ;;  %588 = vst.msk [vmem:[#allocation2 + $0x8] sm:$0xff] %vm144_vm0, %v1905_v49  ;;  %v1914_v54 = vsel %vm500_vm10, %v458_v43, %v516_v51  ;;  %v468_v55 = vadd.f32 %v1552_v53, %v1879_v8  ;;  %v462_v56 = vpop.f32.mrb[11].mxu0 }
 0x17a   : > { %v558_v57 = vld [vmem:[#allocation2 + $0x19] sm:$0xff]  ;;  %v559_v58 = vld [vmem:[#allocation2 + $0x21] sm:$0xff]  ;;  %548 = vst.msk [vmem:[#allocation2 + $0x48] sm:$0xff] %vm144_vm0, %v1914_v54  ;;  %v531_v59 = vsel %vm499_vm11, %v453_v48, %v515_v52  ;;  %v463_v60 = vadd.f32 %v1879_v8, %v462_v56 }
 0x17b   : > { %v1920_v61 = vmax.f32 %v526_v24, %v558_v57  ;;  %v1922_v62 = vmax.f32 %v527_v36, %v559_v58  ;;  %547 = vst.msk [vmem:[#allocation2 + $0x40] sm:$0xff] %vm144_vm0, %v531_v59  ;;  %vm502_vm12 = vcmp.gt.f32.partialorder %v468_v55, 0.0  ;;  %v518_v63 = vmul.f32 0.01, %v468_v55 }
 0x17c   : > { %vm501_vm13 = vcmp.gt.f32.partialorder %v463_v60, 0.0  ;;  %v517_v1 = vmul.f32 0.01, %v463_v60  ;;  %v1555_v2 = vpop.f32.mrb[12].mxu0 }
 0x17d   : > { %591 = vst.msk [vmem:[#allocation2 + $0x20] sm:$0xff] %vm144_vm0, %v1922_v62  ;;  %590 = vst.msk [vmem:[#allocation2 + $0x18] sm:$0xff] %vm144_vm0, %v1920_v61  ;;  %v534_v3 = vsel %vm502_vm12, %v468_v55, %v518_v63  ;;  %v478_v4 = vadd.f32 %v1555_v2, %v1879_v8  ;;  %v472_v5 = vpop.f32.mrb[13].mxu0 }
 0x17e   : > { %v560_v6 = vld [vmem:[#allocation2 + $0x29] sm:$0xff]  ;;  %v561_v7 = vld [vmem:[#allocation2 + $0x31] sm:$0xff]  ;;  %550 = vst.msk [vmem:[#allocation2 + $0x58] sm:$0xff] %vm144_vm0, %v534_v3  ;;  %v533_v9 = vsel %vm501_vm13, %v463_v60, %v517_v1  ;;  %v473_v10 = vadd.f32 %v1879_v8, %v472_v5 }
 0x17f   : > { %v1932_v11 = vmax.f32 %v528_v32, %v560_v6  ;;  %v1934_v12 = vmax.f32 %v529_v47, %v561_v7  ;;  %549 = vst.msk [vmem:[#allocation2 + $0x50] sm:$0xff] %vm144_vm0, %v533_v9  ;;  %vm504_vm14 = vcmp.gt.f32.partialorder %v478_v4, 0.0  ;;  %v520_v13 = vmul.f32 0.01, %v478_v4 }
 0x180   : > { %vm503_vm15 = vcmp.gt.f32.partialorder %v473_v10, 0.0  ;;  %v519_v14 = vmul.f32 0.01, %v473_v10  ;;  %v1558_v15 = vpop.f32.mrb[14].mxu0  ;;  %v604_v16 = vld [vmem:[#allocation2 + $0xa] sm:$0xff]  ;;  %v603_v17 = vld [vmem:[#allocation2 + $0x2] sm:$0xff] }
 0x181   : > { %593 = vst.msk [vmem:[#allocation2 + $0x30] sm:$0xff] %vm144_vm0, %v1934_v12  ;;  %592 = vst.msk [vmem:[#allocation2 + $0x28] sm:$0xff] %vm144_vm0, %v1932_v11  ;;  %v536_v18 = vsel %vm504_vm14, %v478_v4, %v520_v13  ;;  %v488_v19 = vadd.f32 %v1558_v15, %v1879_v8  ;;  %637 = vrot.lane.b32.xlu1 %v604_v16, %s1645_s21  ;;  %635 = vrot.lane.b32.xlu0 %v603_v17, %s1645_s21  ;;  %v482_v20 = vpop.f32.mrb[15].mxu0 }
 0x182   : > { %v562_v21 = vld [vmem:[#allocation2 + $0x39] sm:$0xff]  ;;  %v563_v22 = vld [vmem:[#allocation2 + $0x41] sm:$0xff]  ;;  %552 = vst.msk [vmem:[#allocation2 + $0x68] sm:$0xff] %vm144_vm0, %v536_v18  ;;  %v535_v23 = vsel %vm503_vm15, %v473_v10, %v519_v14  ;;  %v483_v24 = vadd.f32 %v1879_v8, %v482_v20 }
 0x183   : > { %v1947_v25 = vmax.f32 %v1899_v42, %v562_v21  ;;  %v1949_v26 = vmax.f32 %v531_v59, %v563_v22  ;;  %551 = vst.msk [vmem:[#allocation2 + $0x60] sm:$0xff] %vm144_vm0, %v535_v23  ;;  %vm506_vm2 = vcmp.gt.f32.partialorder %v488_v19, 0.0  ;;  %v522_v27 = vmul.f32 0.01, %v488_v19 }
 0x184   : > { %vm505_vm3 = vcmp.gt.f32.partialorder %v483_v24, 0.0  ;;  %v521_v28 = vmul.f32 0.01, %v483_v24  ;;  %v606_v29 = vld [vmem:[#allocation2 + $0x1a] sm:$0xff]  ;;  %v605_v30 = vld [vmem:[#allocation2 + $0x12] sm:$0xff] }
 0x185   : > { %595 = vst.msk [vmem:[#allocation2 + $0x40] sm:$0xff] %vm144_vm0, %v1949_v26  ;;  %594 = vst.msk [vmem:[#allocation2 + $0x38] sm:$0xff] %vm144_vm0, %v1947_v25  ;;  %v538_v8 = vsel %vm506_vm2, %v488_v19, %v522_v27  ;;  %641 = vrot.lane.b32.xlu1 %v606_v29, %s1645_s21  ;;  %639 = vrot.lane.b32.xlu0 %v605_v30, %s1645_s21  ;;  %v1197_v29 = vld [vmem:[%s2218_s1 + $0x28] sm:$0xff]  ;;  %v1198_v30 = vld [vmem:[%s2218_s1 + $0x30] sm:$0xff] }
 0x186   : > { %v564_v31 = vld [vmem:[#allocation2 + $0x49] sm:$0xff]  ;;  %v565_v32 = vld [vmem:[#allocation2 + $0x51] sm:$0xff]  ;;  %554 = vst.msk [vmem:[#allocation2 + $0x78] sm:$0xff] %vm144_vm0, %v538_v8  ;;  %v537_v33 = vsel %vm505_vm3, %v483_v24, %v521_v28  ;;  %v1094_v28 = vld [vmem:[%s2218_s1 + $0x20] sm:$0xff] }
 0x187   : > { %v1960_v34 = vmax.f32 %v1914_v54, %v564_v31  ;;  %v1962_v35 = vmax.f32 %v533_v9, %v565_v32  ;;  %553 = vst.msk [vmem:[#allocation2 + $0x70] sm:$0xff] %vm144_vm0, %v537_v33  ;;  %1588 = vmatpush3.msra.mxu0 %v1094_v28  ;;  %v1615_v31 = vpack.c.bf16 %v1198_v30, %v1197_v29  ;;  %v2061_v32 = vld [vmem:[%s2218_s1 + $0x50] ss:$0 sm:$0xff] }
 0x188   : > { %v608_v36 = vld [vmem:[#allocation2 + $0x2a] sm:$0xff]  ;;  %v607_v37 = vld [vmem:[#allocation2 + $0x22] sm:$0xff] }
 0x189   : > { %597 = vst.msk [vmem:[#allocation2 + $0x50] sm:$0xff] %vm144_vm0, %v1962_v35  ;;  %596 = vst.msk [vmem:[#allocation2 + $0x48] sm:$0xff] %vm144_vm0, %v1960_v34  ;;  %645 = vrot.lane.b32.xlu1 %v608_v36, %s1645_s21  ;;  %643 = vrot.lane.b32.xlu0 %v607_v37, %s1645_s21 }
 0x18a   : > { %v566_v39 = vld [vmem:[#allocation2 + $0x59] sm:$0xff]  ;;  %v567_v40 = vld [vmem:[#allocation2 + $0x61] sm:$0xff] }
 0x18b   : > { %v1971_v41 = vmax.f32 %v534_v3, %v566_v39  ;;  %v1973_v42 = vmax.f32 %v535_v23, %v567_v40 }
 0x18c   : > { %v610_v43 = vld [vmem:[#allocation2 + $0x3a] sm:$0xff]  ;;  %v609_v44 = vld [vmem:[#allocation2 + $0x32] sm:$0xff] }
 0x18d   : > { %599 = vst.msk [vmem:[#allocation2 + $0x60] sm:$0xff] %vm144_vm0, %v1973_v42  ;;  %598 = vst.msk [vmem:[#allocation2 + $0x58] sm:$0xff] %vm144_vm0, %v1971_v41  ;;  %v570_v45 = vld [vmem:[#allocation2 + $0x79] sm:$0xff]  ;;  %649 = vrot.lane.b32.xlu1 %v610_v43, %s1645_s21  ;;  %647 = vrot.lane.b32.xlu0 %v609_v44, %s1645_s21 }
 0x18e   : > { %v1981_v46 = vmax.f32 %v538_v8, %v570_v45  ;;  %v568_v47 = vld [vmem:[#allocation2 + $0x69] sm:$0xff]  ;;  %v569_v48 = vld [vmem:[#allocation2 + $0x71] sm:$0xff]  ;;  %v1647_v8 = vmov 0.0|0.0  }
 0x18f   : > { %v584_v51 = vmax.f32 %v536_v18, %v568_v47  ;;  %v1983_v52 = vmax.f32 %v537_v33, %v569_v48  ;;  %1614 = vmatprep.subr.bf16.mxu1 %v1647_v8  ;;  %1617 = vmatprep.subr.bf16.mxu0 %v1647_v8  ;;  %v995_v33 = vlaneseq }
 0x190   : > { %602 = vst.msk [vmem:[#allocation2 + $0x78] sm:$0xff] %vm144_vm0, %v1981_v46  ;;  %v612_v53 = vld [vmem:[#allocation2 + $0x4a] sm:$0xff]  ;;  %v611_v54 = vld [vmem:[#allocation2 + $0x42] sm:$0xff] }
 0x191   : > { %601 = vst.msk [vmem:[#allocation2 + $0x70] sm:$0xff] %vm144_vm0, %v1983_v52  ;;  %600 = vst.msk [vmem:[#allocation2 + $0x68] sm:$0xff] %vm144_vm0, %v584_v51  ;;  %653 = vrot.lane.b32.xlu1 %v612_v53, %s1645_s21  ;;  %651 = vrot.lane.b32.xlu0 %v611_v54, %s1645_s21  ;;  %v996_v40 = vshrl.u32 %v995_v33, 7 }
 0x194   : > { %v614_v55 = vld [vmem:[#allocation2 + $0x5a] sm:$0xff]  ;;  %v613_v56 = vld [vmem:[#allocation2 + $0x52] sm:$0xff] }
 0x195   : > { %657 = vrot.lane.b32.xlu1 %v614_v55, %s1645_s21  ;;  %655 = vrot.lane.b32.xlu0 %v613_v56, %s1645_s21 }
 0x197   : > { %v618_v59 = vld [vmem:[#allocation2 + $0x7a] sm:$0xff] }
 0x198   : > { %v616_v57 = vld [vmem:[#allocation2 + $0x6a] sm:$0xff]  ;;  %v615_v58 = vld [vmem:[#allocation2 + $0x62] sm:$0xff]  ;;  %v617_v60 = vld [vmem:[#allocation2 + $0x72] sm:$0xff] }
 0x199   : > { %661 = vrot.lane.b32.xlu1 %v616_v57, %s1645_s21  ;;  %659 = vrot.lane.b32.xlu0 %v615_v58, %s1645_s21 }
 0x19d   : > { %665 = vrot.lane.b32.xlu1 %v618_v59, %s1645_s21  ;;  %663 = vrot.lane.b32.xlu0 %v617_v60, %s1645_s21 }
 0x1f3   : > { %v638_v63 = vpop.permute.xlu1 %637  ;;  %v636_v1 = vpop.permute.xlu0 %635 }
 0x1f4   : > { %v684_v2 = vsel %vm144_vm0, %v1905_v49, %v638_v63  ;;  %v683_v3 = vsel %vm144_vm0, %v1894_v38, %v636_v1 }
 0x1f5   : > { %1563 = vmatprep.mubr.msk.f32.mxu1 %vm297_vm1, %v683_v3 }
 0x1f6   : > { %1564 = vmatmul.mubr.msk.f32.vlgmr.msra.gmra.mrb[0].mxu1 %vm297_vm1, %v684_v2  ;;  %v998_v2 = vand.u32 3, %v996_v40 }
 0x1f7   : > { %v642_v4 = vpop.permute.xlu1 %641  ;;  %v640_v5 = vpop.permute.xlu0 %639  ;;  %1616 = vmatpush3.bf16.msra.mxu1 %v1615_v31 }
 0x1f8   : > { %v686_v6 = vsel %vm144_vm0, %v1920_v61, %v642_v4  ;;  %v685_v7 = vsel %vm144_vm0, %v1907_v50, %v640_v5  ;;  %vm2090_vm15 = vcmp.eq.s32.totalorder %v998_v2, 0 }
 0x1f9   : > { %1566 = vmatprep.mubr.msk.f32.mxu1 %vm297_vm1, %v685_v7 }
 0x1fa   : > { %1567 = vmatmul.mubr.msk.f32.gmra.mrb[2].mxu1 %vm297_vm1, %v686_v6 }
 0x1fb   : > { %v646_v49 = vpop.permute.xlu1 %645  ;;  %v644_v9 = vpop.permute.xlu0 %643 }
 0x1fc   : > { %v688_v38 = vsel %vm144_vm0, %v1932_v11, %v646_v49  ;;  %v687_v10 = vsel %vm144_vm0, %v1922_v62, %v644_v9 }
 0x1fd   : > { %1569 = vmatprep.mubr.msk.f32.mxu1 %vm297_vm1, %v687_v10 }
 0x1fe   : > { %1570 = vmatmul.mubr.msk.f32.gmra.mrb[4].mxu1 %vm297_vm1, %v688_v38 }
 0x1ff   : > { %v650_v61 = vpop.permute.xlu1 %649  ;;  %v648_v13 = vpop.permute.xlu0 %647 }
 0x200   : > { %v690_v50 = vsel %vm144_vm0, %v1947_v25, %v650_v61  ;;  %v689_v14 = vsel %vm144_vm0, %v1934_v12, %v648_v13 }
 0x201   : > { %1572 = vmatprep.mubr.msk.f32.mxu1 %vm297_vm1, %v689_v14 }
 0x202   : > { %1573 = vmatmul.mubr.msk.f32.gmra.mrb[6].mxu1 %vm297_vm1, %v690_v50 }
 0x203   : > { %v654_v11 = vpop.permute.xlu1 %653  ;;  %v652_v15 = vpop.permute.xlu0 %651 }
 0x204   : > { %v692_v62 = vsel %vm144_vm0, %v1960_v34, %v654_v11  ;;  %v691_v16 = vsel %vm144_vm0, %v1949_v26, %v652_v15 }
 0x205   : > { %1575 = vmatprep.mubr.msk.f32.mxu1 %vm297_vm1, %v691_v16 }
 0x206   : > { %1576 = vmatmul.mubr.msk.f32.gmra.mrb[8].mxu1 %vm297_vm1, %v692_v62 }
 0x207   : > { %v658_v17 = vpop.permute.xlu1 %657  ;;  %v656_v18 = vpop.permute.xlu0 %655 }
 0x208   : > { %v694_v12 = vsel %vm144_vm0, %v1971_v41, %v658_v17  ;;  %v693_v19 = vsel %vm144_vm0, %v1962_v35, %v656_v18 }
 0x209   : > { %1578 = vmatprep.mubr.msk.f32.mxu1 %vm297_vm1, %v693_v19 }
 0x20a   : > { %1579 = vmatmul.mubr.msk.f32.gmra.mrb[10].mxu1 %vm297_vm1, %v694_v12 }
 0x20b   : > { %v662_v20 = vpop.permute.xlu1 %661  ;;  %v660_v21 = vpop.permute.xlu0 %659 }
 0x20c   : > { %v696_v22 = vsel %vm144_vm0, %v584_v51, %v662_v20  ;;  %v695_v23 = vsel %vm144_vm0, %v1973_v42, %v660_v21  ;;  %v997_v51 = vadd.s32 8, %v996_v40 }
 0x20d   : > { %1581 = vmatprep.mubr.msk.f32.mxu1 %vm297_vm1, %v695_v23 }
 0x20e   : > { %1582 = vmatmul.mubr.msk.f32.gmra.mrb[12].mxu1 %vm297_vm1, %v696_v22  ;;  %v999_v60 = vand.u32 3, %v997_v51  ;;  %vm1003_vm13 = vcmp.lt.s32.totalorder %v997_v51, 12 }
 0x20f   : > { %v666_v24 = vpop.permute.xlu1 %665  ;;  %v664_v25 = vpop.permute.xlu0 %663 }
 0x210   : > { %v698_v26 = vsel %vm144_vm0, %v1981_v46, %v666_v24  ;;  %v697_v27 = vsel %vm144_vm0, %v1983_v52, %v664_v25  ;;  %vm1001_vm12 = vcmp.eq.s32.totalorder %v999_v60, 0 }
 0x211   : > { %1584 = vmatprep.mubr.msk.f32.mxu1 %vm297_vm1, %v697_v27  ;;  %vm2100_vm2 = vmand %vm1001_vm12, %vm1003_vm13  ;;  %vm1108_vm12 = vcmask 1041409   ;;  %vm1110_vm13 = vcmask 1042434  }
 0x212   : > { %1585 = vmatmul.mubr.msk.f32.gmra.mrb[14].mxu1 %vm297_vm1, %v698_v26 }
 0x213   : > { %1596 = vmatprep.mubr.msk.f32.mxu1 %vm1646_vm4, %v1644_v0 }
 0x2c9   : > { %v1565_v34 = vpop.f32.mrb[0].mxu1 }
 0x2ca   : > { %v826_v35 = vadd.f32 %v1565_v34, %v2061_v32  ;;  %v820_v36 = vpop.f32.mrb[1].mxu1 }
 0x2cb   : > { %v821_v37 = vadd.f32 %v2061_v32, %v820_v36 }
 0x2cc   : > { %vm900_vm5 = vcmp.gt.f32.partialorder %v826_v35, 0.0  ;;  %v916_v39 = vmul.f32 0.01, %v826_v35 }
 0x2cd   : > { %vm899_vm6 = vcmp.gt.f32.partialorder %v821_v37, 0.0  ;;  %v915_v41 = vmul.f32 0.01, %v821_v37  ;;  %v1568_v42 = vpop.f32.mrb[2].mxu1 }
 0x2ce   : > { %v2066_v43 = vsel %vm900_vm5, %v826_v35, %v916_v39  ;;  %v836_v44 = vadd.f32 %v1568_v42, %v2061_v32  ;;  %v830_v45 = vpop.f32.mrb[3].mxu1 }
 0x2cf   : > { %948 = vst.msk [vmem:[#allocation2 + $0x8] sm:$0xff] %vm144_vm0, %v2066_v43  ;;  %v931_v46 = vsel %vm899_vm6, %v821_v37, %v915_v41  ;;  %v831_v47 = vadd.f32 %v2061_v32, %v830_v45 }
 0x2d0   : > { %947 = vst.msk [vmem:[#allocation2] sm:$0xff] %vm144_vm0, %v931_v46  ;;  %vm902_vm7 = vcmp.gt.f32.partialorder %v836_v44, 0.0  ;;  %v918_v48 = vmul.f32 0.01, %v836_v44 }
 0x2d1   : > { %vm901_vm8 = vcmp.gt.f32.partialorder %v831_v47, 0.0  ;;  %v917_v52 = vmul.f32 0.01, %v831_v47  ;;  %v1571_v53 = vpop.f32.mrb[4].mxu1 }
 0x2d2   : > { %v2073_v54 = vsel %vm902_vm7, %v836_v44, %v918_v48  ;;  %v846_v55 = vadd.f32 %v1571_v53, %v2061_v32  ;;  %v840_v56 = vpop.f32.mrb[5].mxu1 }
 0x2d3   : > { %950 = vst.msk [vmem:[#allocation2 + $0x18] sm:$0xff] %vm144_vm0, %v2073_v54  ;;  %v933_v57 = vsel %vm901_vm8, %v831_v47, %v917_v52  ;;  %v841_v58 = vadd.f32 %v2061_v32, %v840_v56 }
 0x2d4   : > { %949 = vst.msk [vmem:[#allocation2 + $0x10] sm:$0xff] %vm144_vm0, %v933_v57  ;;  %vm904_vm9 = vcmp.gt.f32.partialorder %v846_v55, 0.0  ;;  %v920_v59 = vmul.f32 0.01, %v846_v55 }
 0x2d5   : > { %vm903_vm10 = vcmp.gt.f32.partialorder %v841_v58, 0.0  ;;  %v919_v63 = vmul.f32 0.01, %v841_v58  ;;  %v1574_v1 = vpop.f32.mrb[6].mxu1 }
 0x2d6   : > { %v2080_v3 = vsel %vm904_vm9, %v846_v55, %v920_v59  ;;  %v856_v4 = vadd.f32 %v1574_v1, %v2061_v32  ;;  %v850_v5 = vpop.f32.mrb[7].mxu1 }
 0x2d7   : > { %v963_v6 = vld [vmem:[#allocation2 + $0x2] sm:$0xff]  ;;  %952 = vst.msk [vmem:[#allocation2 + $0x28] sm:$0xff] %vm144_vm0, %v2080_v3  ;;  %v2085_v7 = vsel %vm903_vm10, %v841_v58, %v919_v63  ;;  %v851_v49 = vadd.f32 %v2061_v32, %v850_v5 }
 0x2d8   : > { %951 = vst.msk [vmem:[#allocation2 + $0x20] sm:$0xff] %vm144_vm0, %v2085_v7  ;;  %vm906_vm11 = vcmp.gt.f32.partialorder %v856_v4, 0.0  ;;  %v922_v9 = vmul.f32 0.01, %v856_v4  ;;  %v979_v38 = vmax.f32 %v931_v46, %v963_v6 }
 0x2d9   : > { %vm905_vm14 = vcmp.gt.f32.partialorder %v851_v49, 0.0  ;;  %v921_v10 = vmul.f32 0.01, %v851_v49  ;;  %v1577_v61 = vpop.f32.mrb[8].mxu1 }
 0x2da   : > { %v2094_v50 = vsel %vm906_vm11, %v856_v4, %v922_v9  ;;  %v866_v14 = vadd.f32 %v1577_v61, %v2061_v32  ;;  %v860_v11 = vpop.f32.mrb[9].mxu1  ;;  %v1006_v21 = vsel %vm2090_vm15, %v979_v38, 0.0 }
 0x2db   : > { %v965_v15 = vld [vmem:[#allocation2 + $0x12] sm:$0xff]  ;;  %954 = vst.msk [vmem:[#allocation2 + $0x38] sm:$0xff] %vm144_vm0, %v2094_v50  ;;  %v937_v62 = vsel %vm905_vm14, %v851_v49, %v921_v10  ;;  %v861_v16 = vadd.f32 %v2061_v32, %v860_v11  ;;  %v964_v18 = vld [vmem:[#allocation2 + $0xa] sm:$0xff]  ;;  %v1022_v35 = vsel %vm144_vm0, %v1006_v21, 0.0  ;;  %vm1112_vm14 = vcmask 1043459  }
 0x2dc   : > { %v981_v12 = vmax.f32 %v933_v57, %v965_v15  ;;  %953 = vst.msk [vmem:[#allocation2 + $0x30] sm:$0xff] %vm144_vm0, %v937_v62  ;;  %vm908_vm3 = vcmp.gt.f32.partialorder %v866_v14, 0.0  ;;  %v924_v19 = vmul.f32 0.01, %v866_v14  ;;  %v980_v20 = vmax.f32 %v2066_v43, %v964_v18 }
 0x2dd   : > { %vm907_vm5 = vcmp.gt.f32.partialorder %v861_v16, 0.0  ;;  %v923_v22 = vmul.f32 0.01, %v861_v16  ;;  %v1580_v23 = vpop.f32.mrb[10].mxu1 }
 0x2de   : > { %v2108_v24 = vsel %vm908_vm3, %v866_v14, %v924_v19  ;;  %v876_v25 = vadd.f32 %v1580_v23, %v2061_v32  ;;  %v870_v26 = vpop.f32.mrb[11].mxu1  ;;  %v1007_v27 = vsel %vm2100_vm2, %v980_v20, 0.0  ;;  %v1008_v28 = vsel %vm2090_vm15, %v981_v12, 0.0 }
 0x2df   : > { %v967_v29 = vld [vmem:[#allocation2 + $0x22] sm:$0xff]  ;;  %956 = vst.msk [vmem:[#allocation2 + $0x48] sm:$0xff] %vm144_vm0, %v2108_v24  ;;  %v939_v30 = vsel %vm907_vm5, %v861_v16, %v923_v22  ;;  %v871_v8 = vadd.f32 %v2061_v32, %v870_v26  ;;  %v966_v31 = vld [vmem:[#allocation2 + $0x1a] sm:$0xff]  ;;  %v1023_v34 = vsel %vm144_vm0, %v1007_v27, 0.0  ;;  %v1031_v43 = vsel %vm144_vm0, %v1008_v28, 0.0 }
 0x2e0   : > { %955 = vst.msk [vmem:[#allocation2 + $0x40] sm:$0xff] %vm144_vm0, %v939_v30  ;;  %vm910_vm6 = vcmp.gt.f32.partialorder %v876_v25, 0.0  ;;  %v926_v36 = vmul.f32 0.01, %v876_v25  ;;  %v982_v37 = vmax.f32 %v2073_v54, %v966_v31  ;;  %v983_v39 = vmax.f32 %v2085_v7, %v967_v29 }
 0x2e1   : > { %vm909_vm7 = vcmp.gt.f32.partialorder %v871_v8, 0.0  ;;  %v925_v40 = vmul.f32 0.01, %v871_v8  ;;  %v1583_v41 = vpop.f32.mrb[12].mxu1  ;;  %v1024_v42 = vadd.f32 %v1023_v34, %v1022_v35  ;;  %vm1118_vm3 = vcmask 1046534  }
 0x2e2   : > { %v2124_v44 = vsel %vm910_vm6, %v876_v25, %v926_v36  ;;  %v886_v45 = vadd.f32 %v1583_v41, %v2061_v32  ;;  %v880_v46 = vpop.f32.mrb[13].mxu1  ;;  %v1009_v53 = vsel %vm2100_vm2, %v982_v37, 0.0  ;;  %v1010_v58 = vsel %vm2090_vm15, %v983_v39, 0.0 }
 0x2e3   : > { %v969_v47 = vld [vmem:[#allocation2 + $0x32] sm:$0xff]  ;;  %958 = vst.msk [vmem:[#allocation2 + $0x58] sm:$0xff] %vm144_vm0, %v2124_v44  ;;  %v941_v48 = vsel %vm909_vm7, %v871_v8, %v925_v40  ;;  %v881_v51 = vadd.f32 %v2061_v32, %v880_v46  ;;  %v968_v52 = vld [vmem:[#allocation2 + $0x2a] sm:$0xff]  ;;  %v1025_v54 = vrot.slane %v1024_v42, 4  ;;  %v1032_v6 = vsel %vm144_vm0, %v1009_v53, 0.0 }
 0x2e4   : > { %v985_v55 = vmax.f32 %v937_v62, %v969_v47  ;;  %957 = vst.msk [vmem:[#allocation2 + $0x50] sm:$0xff] %vm144_vm0, %v941_v48  ;;  %vm912_vm8 = vcmp.gt.f32.partialorder %v886_v45, 0.0  ;;  %v928_v56 = vmul.f32 0.01, %v886_v45  ;;  %v984_v57 = vmax.f32 %v2080_v3, %v968_v52 }
 0x2e5   : > { %vm911_vm9 = vcmp.gt.f32.partialorder %v881_v51, 0.0  ;;  %v927_v59 = vmul.f32 0.01, %v881_v51  ;;  %v1586_v60 = vpop.f32.mrb[14].mxu1  ;;  %v1026_v63 = vadd.f32 %v1025_v54, %v1024_v42  ;;  %v1033_v16 = vadd.f32 %v1032_v6, %v1031_v43 }
 0x2e6   : > { %v1012_v1 = vsel %vm2090_vm15, %v985_v55, 0.0  ;;  %v2138_v2 = vsel %vm912_vm8, %v886_v45, %v928_v56  ;;  %v896_v4 = vadd.f32 %v1586_v60, %v2061_v32  ;;  %v890_v5 = vpop.f32.mrb[15].mxu1  ;;  %v1011_v38 = vsel %vm2100_vm2, %v984_v57, 0.0 }
 0x2e7   : > { %v971_v7 = vld [vmem:[#allocation2 + $0x42] sm:$0xff]  ;;  %960 = vst.msk [vmem:[#allocation2 + $0x68] sm:$0xff] %vm144_vm0, %v2138_v2  ;;  %v943_v3 = vsel %vm911_vm9, %v881_v51, %v927_v59  ;;  %v891_v49 = vadd.f32 %v2061_v32, %v890_v5  ;;  %v970_v9 = vld [vmem:[#allocation2 + $0x3a] sm:$0xff]  ;;  %v1027_v10 = vrot.slane %v1026_v63, 2  ;;  %v1040_v18 = vsel %vm144_vm0, %v1010_v58, 0.0 }
 0x2e8   : > { %v987_v61 = vmax.f32 %v939_v30, %v971_v7  ;;  %959 = vst.msk [vmem:[#allocation2 + $0x60] sm:$0xff] %vm144_vm0, %v943_v3  ;;  %vm914_vm10 = vcmp.gt.f32.partialorder %v896_v4, 0.0  ;;  %v930_v14 = vmul.f32 0.01, %v896_v4  ;;  %v986_v11 = vmax.f32 %v2094_v50, %v970_v9 }
 0x2e9   : > { %vm913_vm11 = vcmp.gt.f32.partialorder %v891_v49, 0.0  ;;  %v929_v15 = vmul.f32 0.01, %v891_v49  ;;  %v1028_v62 = vadd.f32 %v1027_v10, %v1026_v63  ;;  %v1041_v19 = vsel %vm144_vm0, %v1011_v38, 0.0 }
 0x2ea   : > { %v946_v12 = vsel %vm914_vm10, %v896_v4, %v930_v14  ;;  %v1013_v32 = vsel %vm2100_vm2, %v986_v11, 0.0  ;;  %v1049_v20 = vsel %vm144_vm0, %v1012_v1, 0.0  ;;  %v1014_v21 = vsel %vm2090_vm15, %v987_v61, 0.0 }
 0x2eb   : > { %v973_v22 = vld [vmem:[#allocation2 + $0x52] sm:$0xff]  ;;  %962 = vst.msk [vmem:[#allocation2 + $0x78] sm:$0xff] %vm144_vm0, %v946_v12  ;;  %v945_v50 = vsel %vm913_vm11, %v891_v49, %v929_v15  ;;  %v972_v23 = vld [vmem:[#allocation2 + $0x4a] sm:$0xff]  ;;  %v1034_v25 = vrot.slane %v1033_v16, 4  ;;  %v1042_v28 = vadd.f32 %v1041_v19, %v1040_v18  ;;  %v1050_v29 = vsel %vm144_vm0, %v1013_v32, 0.0 }
 0x2ec   : > { %v989_v26 = vmax.f32 %v941_v48, %v973_v22  ;;  %961 = vst.msk [vmem:[#allocation2 + $0x70] sm:$0xff] %vm144_vm0, %v945_v50  ;;  %v988_v27 = vmax.f32 %v2108_v24, %v972_v23  ;;  %v1029_v30 = vrot.slane %v1028_v62, 1  ;;  %v1051_v31 = vadd.f32 %v1050_v29, %v1049_v20 }
 0x2ed   : > { %v1035_v8 = vadd.f32 %v1034_v25, %v1033_v16  ;;  %v1043_v36 = vrot.slane %v1042_v28, 4  ;;  %v1058_v37 = vsel %vm144_vm0, %v1014_v21, 0.0  ;;  %vm1120_vm5 = vcmask 1047559  }
 0x2ee   : > { %v1016_v34 = vsel %vm2090_vm15, %v989_v26, 0.0  ;;  %v1015_v35 = vsel %vm2100_vm2, %v988_v27, 0.0  ;;  %v1052_v24 = vrot.slane %v1051_v31, 4  ;;  %v1030_v51 = vadd.f32 %v1029_v30, %v1028_v62 }
 0x2ef   : > { %v975_v39 = vld [vmem:[#allocation2 + $0x62] sm:$0xff]  ;;  %v974_v40 = vld [vmem:[#allocation2 + $0x5a] sm:$0xff]  ;;  %v1036_v41 = vrot.slane %v1035_v8, 2  ;;  %v1059_v42 = vsel %vm144_vm0, %v1015_v35, 0.0  ;;  %v1044_v46 = vadd.f32 %v1043_v36, %v1042_v28  ;;  %v1067_v48 = vsel %vm144_vm0, %v1016_v34, 0.0 }
 0x2f0   : > { %v991_v43 = vmax.f32 %v943_v3, %v975_v39  ;;  %v990_v45 = vmax.f32 %v2124_v44, %v974_v40  ;;  %v1060_v47 = vadd.f32 %v1059_v42, %v1058_v37  ;;  %v1053_v53 = vadd.f32 %v1052_v24, %v1051_v31 }
 0x2f1   : > { %v1037_v52 = vadd.f32 %v1036_v41, %v1035_v8  ;;  %v1045_v57 = vrot.slane %v1044_v46, 2 }
 0x2f2   : > { %v1018_v54 = vsel %vm2090_vm15, %v991_v43, 0.0  ;;  %v978_v55 = vld [vmem:[#allocation2 + $0x7a] sm:$0xff]  ;;  %v1017_v56 = vsel %vm2100_vm2, %v990_v45, 0.0  ;;  %v1061_v58 = vrot.slane %v1060_v47, 4  ;;  %v1054_v4 = vrot.slane %v1053_v53, 2 }
 0x2f3   : > { %v1076_v59 = vsel %vm144_vm0, %v1018_v54, 0.0  ;;  %v994_v44 = vmax.f32 %v946_v12, %v978_v55  ;;  %v977_v60 = vld [vmem:[#allocation2 + $0x72] sm:$0xff]  ;;  %v976_v63 = vld [vmem:[#allocation2 + $0x6a] sm:$0xff]  ;;  %v1038_v1 = vrot.slane %v1037_v52, 1  ;;  %v1046_v7 = vadd.f32 %v1045_v57, %v1044_v46 }
 0x2f4   : > { %v993_v5 = vmax.f32 %v945_v50, %v977_v60  ;;  %v992_v6 = vmax.f32 %v2138_v2, %v976_v63  ;;  %v1062_v3 = vadd.f32 %v1061_v58, %v1060_v47  ;;  %v1055_v38 = vadd.f32 %v1054_v4, %v1053_v53  ;;  %v1280_v58 = vld [vmem:[%s2218_s1 + $0x38] sm:$0xff] }
 0x2f5   : > { %v1021_v49 = vsel %vm2100_vm2, %v994_v44, 0.0  ;;  %v1039_v9 = vadd.f32 %v1038_v1, %v1037_v52  ;;  %v1068_v10 = vsel %vm144_vm0, %v1017_v56, 0.0  ;;  %v1047_v15 = vrot.slane %v1046_v7, 1  ;;  %v1478_v52 = vld [vmem:[%s2218_s1 + $0x58] ss:$0 sm:$0xff] }
 0x2f6   : > { %v1086_v61 = vsel %vm144_vm0, %v1021_v49, 0.0  ;;  %v1020_v14 = vsel %vm2090_vm15, %v993_v5, 0.0  ;;  %v1019_v11 = vsel %vm2100_vm2, %v992_v6, 0.0  ;;  %v1056_v62 = vrot.slane %v1055_v38, 1  ;;  %v1480_v44 = vld [vmem:[%s2218_s1 + $0x60] ss:$0 sm:$0xff] }
 0x2f7   : > { %v1085_v2 = vsel %vm144_vm0, %v1020_v14, 0.0  ;;  %v1063_v16 = vrot.slane %v1062_v3, 2  ;;  %v1069_v18 = vadd.f32 %v1068_v10, %v1067_v48  ;;  %v1048_v32 = vadd.f32 %v1047_v15, %v1046_v7  ;;  %v1482_v6 = vld [vmem:[%s2218_s1 + $0x68] ss:$0 sm:$0xff] }
 0x2f8   : > { %v1087_v12 = vadd.f32 %v1086_v61, %v1085_v2  ;;  %v1077_v19 = vsel %vm144_vm0, %v1019_v11, 0.0  ;;  %v1109_v20 = vsel %vm1108_vm12, %v1039_v9, %v1030_v51  ;;  %v1057_v21 = vadd.f32 %v1056_v62, %v1055_v38 }
 0x2f9   : > { %v1064_v22 = vadd.f32 %v1063_v16, %v1062_v3  ;;  %v1070_v50 = vrot.slane %v1069_v18, 4  ;;  %v1078_v13 = vadd.f32 %v1077_v19, %v1076_v59  ;;  %v1111_v17 = vsel %vm1110_vm13, %v1048_v32, %v1109_v20 }
 0x2fa   : > { %v1088_v23 = vrot.slane %v1087_v12, 4  ;;  %v1113_v28 = vsel %vm1112_vm14, %v1057_v21, %v1111_v17  ;;  %vm1114_vm15 = vcmask 1044484   ;;  %vm1116_vm2 = vcmask 1045509  }
 0x2fb   : > { %v1065_v25 = vrot.slane %v1064_v22, 1  ;;  %v1071_v26 = vadd.f32 %v1070_v50, %v1069_v18  ;;  %v1079_v27 = vrot.slane %v1078_v13, 4  ;;  %v1361_v18 = vand.u32 127, %v995_v33 }
 0x2fc   : > { %v1089_v29 = vadd.f32 %v1088_v23, %v1087_v12 }
 0x2fd   : > { %v1066_v30 = vadd.f32 %v1065_v25, %v1064_v22  ;;  %v1072_v8 = vrot.slane %v1071_v26, 2  ;;  %v1080_v31 = vadd.f32 %v1079_v27, %v1078_v13  ;;  %vm1380_vm8 = vcmp.lt.s32.totalorder %v1361_v18, 4 }
 0x2fe   : > { %v1090_v34 = vrot.slane %v1089_v29, 2 }
 0x2ff   : > { %v1073_v35 = vadd.f32 %v1072_v8, %v1071_v26  ;;  %v1081_v36 = vrot.slane %v1080_v31, 2  ;;  %v1115_v37 = vsel %vm1114_vm15, %v1066_v30, %v1113_v28 }
 0x300   : > { %v1091_v39 = vadd.f32 %v1090_v34, %v1089_v29 }
 0x301   : > { %v1074_v40 = vrot.slane %v1073_v35, 1  ;;  %v1082_v41 = vadd.f32 %v1081_v36, %v1080_v31 }
 0x302   : > { %v1092_v24 = vrot.slane %v1091_v39, 1 }
 0x303   : > { %v1075_v42 = vadd.f32 %v1074_v40, %v1073_v35  ;;  %v1083_v43 = vrot.slane %v1082_v41, 1 }
 0x304   : > { %v1093_v45 = vadd.f32 %v1092_v24, %v1091_v39 }
 0x305   : > { %v1084_v46 = vadd.f32 %v1083_v43, %v1082_v41  ;;  %v1117_v47 = vsel %vm1116_vm2, %v1075_v42, %v1115_v37 }
 0x307   : > { %v1119_v48 = vsel %vm1118_vm3, %v1084_v46, %v1117_v47 }
 0x308   : > { %v1121_v51 = vsel %vm1120_vm5, %v1093_v45, %v1119_v48 }
 0x309   : > { %1590 = vmatmul.mubr.msk.f32.vlgmr.msra.gmra.mrb[16].mxu0 %vm144_vm0, %v1121_v51 }
 0x30a   : > { %1603 = vmatprep.mubr.msk.f32.mxu0 %vm1646_vm4, %v1644_v0  ;;  %v1281_v0 = vld [vmem:[%s2218_s1 + $0x40] sm:$0xff] }
 0x30b   : > { %v1618_v59 = vpack.c.bf16 %v1281_v0, %v1280_v58 }
 0x30d   : > { %1619 = vmatpush3.bf16.msra.mxu0 %v1618_v59 }
 0x3dc   : > { %v1190_v53 = vpop.f32.mrb[16].mxu0 }
 0x3dd   : > { %v1191_v54 = vadd.f32 %v1478_v52, %v1190_v53  ;;  %v1591_v55 = vpop.f32.mrb[17].mxu0 }
 0x3df   : > { %vm1194_vm6 = vcmp.gt.f32.partialorder %v1191_v54, 0.0  ;;  %v1195_v56 = vmul.f32 0.01, %v1191_v54 }
 0x3e1   : > { %v1196_v57 = vsel %vm1194_vm6, %v1191_v54, %v1195_v56 }
 0x3e2   : > { %1597 = vmatmul.mubr.msk.f32.vlgmr.msra.gmra.mrb[16].mxu1 %vm297_vm1, %v1196_v57 }
 0x4b5   : > { %v1273_v60 = vpop.f32.mrb[16].mxu1 }
 0x4b6   : > { %v1274_v63 = vadd.f32 %v1480_v44, %v1273_v60  ;;  %v1598_v1 = vpop.f32.mrb[17].mxu1 }
 0x4b8   : > { %vm1277_vm4 = vcmp.gt.f32.partialorder %v1274_v63, 0.0  ;;  %v1278_v4 = vmul.f32 0.01, %v1274_v63 }
 0x4ba   : > { %v1279_v5 = vsel %vm1277_vm4, %v1274_v63, %v1278_v4 }
 0x4bb   : > { %1604 = vmatmul.mubr.msk.f32.vlgmr.msra.gmra.mrb[18].mxu0 %vm297_vm1, %v1279_v5 }
 0x58e   : > { %v1356_v7 = vpop.f32.mrb[18].mxu0 }
 0x58f   : > { %v1357_v3 = vadd.f32 %v1482_v6, %v1356_v7  ;;  %v1605_v49 = vpop.f32.mrb[19].mxu0 }
 0x591   : > { %v1365_v9 = vmin.f32 %v1357_v3, 20.0  ;;  %vm1364_vm7 = vcmp.gt.f32.partialorder %v1357_v3, 20.0  ;;  %v1484_v20 = vclamps-f32 %v1357_v3, 1.0 }
 0x593   : > { %v1366_v38 = vmul.f32 1.442695, %v1365_v9 }
 0x595   : > { %1632 = vpow2.f32 %v1366_v38 }
 0x59f   : > { %v1633_v10 = vpop.eup %1632 }
 0x5a0   : > { %v1368_v61 = vadd.f32 1.0, %v1633_v10  ;;  %v1371_v14 = vmul.f32 -0.5, %v1633_v10  ;;  %v1374_v15 = vand.u32 2147483647, %v1633_v10 }
 0x5a2   : > { %1634 = vlog2.f32 %v1368_v61  ;;  %v1372_v11 = vadd.f32 1.0, %v1371_v14  ;;  %vm1375_vm1 = vcmp.lt.f32.partialorder %v1374_v15, 0.0004427343 }
 0x5a4   : > { %v1373_v16 = vmul.f32 %v1633_v10, %v1372_v11 }
 0x5ac   : > { %v1635_v2 = vpop.eup %1634 }
 0x5ad   : > { %v1370_v62 = vmul.f32 0.6931472, %v1635_v2 }
 0x5af   : > { %v1376_v12 = vsel %vm1375_vm1, %v1373_v16, %v1370_v62 }
 0x5b0   : > { %v1377_v32 = vsel %vm1364_vm7, %v1357_v3, %v1376_v12 }
 0x5b1   : > { %v1378_v19 = vmax.f32 %v1377_v32, 1e-10 }
 0x5b3   : > { %v1379_v21 = vmin.f32 %v1378_v19, 1.0 }
 0x5b5   : > { %v1381_v22 = vsel %vm1380_vm8, %v1484_v20, %v1379_v21 }
 0x5b6   : > { %1382 = vst.msk [vmem:[%s143_s23] sm:$0xff] %vm144_vm0, %v1381_v22 }
 0x5b7 PF: > { %s12_s9 = sadd.s32 1, %s1642_s9  }
 0x5b8   : > { %p9_p5 = scmp.ge.s32.totalorder %s12_s9, 4  }
 0x5ba   :  { %11 = sbr.rel (!%p9_p5) target bundleno = 1 (0x1), region = 58 }

</bundles_post_ra>
